<compile_context>
chip_gen: v6e
topology: v6e:2x2x1
jax: 0.10.0
libtpu: 0.0.40
codegen_flags: <defaults>
</compile_context>

<pallas_src>
import math

import jax
import jax.numpy as jnp
from jax.experimental import pallas as pl
from jax.experimental.pallas import tpu as pltpu

F32 = jnp.float32
BF16 = jnp.bfloat16


def _round_up(n, m):
    return ((n + m - 1) // m) * m


# ---------------------------------------------------------------------------
# Kernel 1: node-embedding MLP (Linear -> ReLU -> Linear), row-block grid
# ---------------------------------------------------------------------------
def _node_emb_kernel(x_ref, w1_ref, b1_ref, w2_ref, b2_ref, o_ref):
    h = jnp.dot(x_ref[...], w1_ref[...], preferred_element_type=F32) + b1_ref[...]
    h = jnp.maximum(h, 0.0)
    h = jnp.dot(h.astype(BF16), w2_ref[...], preferred_element_type=F32) + b2_ref[...]
    o_ref[...] = h.astype(BF16)


# ---------------------------------------------------------------------------
# Kernel 2: GAT projection for one conv block, row-block grid.
#   xsd = h @ [W_src | W_dst]                 (one MXU matmul)
#   a_s = att_src . x_src   -> [1, TR]        (lane-major on the MXU, no transpose)
#   a_d = att_dst . x_dst   -> [TR, 1]        (MXU)
#   xs1 = [x_src | 1]       -> [TR, H+1]      (ones lane feeds the MXU denom trick)
# ---------------------------------------------------------------------------
def _project_kernel(h_ref, wg_ref, asrc_ref, adst_ref, xs1_ref, as_ref, ad_ref):
    hidden = wg_ref.shape[0]
    xsd = jnp.dot(h_ref[...], wg_ref[...], preferred_element_type=F32)        # [TR, 2H]
    xs = xsd[:, :hidden].astype(BF16)
    xd = xsd[:, hidden:].astype(BF16)
    as_ref[...] = jax.lax.dot_general(asrc_ref[...], xs, (((1,), (1,)), ((), ())),
                                      preferred_element_type=F32)             # [1, TR]
    ad_ref[...] = jax.lax.dot_general(xd, adst_ref[...], (((1,), (1,)), ((), ())),
                                      preferred_element_type=F32)             # [TR, 1]
    ones = jnp.ones((xs.shape[0], 1), BF16)
    xs1_ref[...] = jnp.concatenate([xs, ones], axis=1)                        # [TR, H+1]


# ---------------------------------------------------------------------------
# Kernel 3: GAT attention + mean aggregation + bias + post-MLP + ReLU.
# Grid (rows, cols); rows parallel, cols accumulate into a [TR, H+1] VMEM scratch.
# ---------------------------------------------------------------------------
def _attn_kernel(ad_ref, m_ref, as_ref, adj_ref, xs1_ref, invdeg_ref,
                 bg_ref, wpa_ref, bpa_ref, wpb_ref, bpb_ref,
                 o_ref, acc_ref):
    hidden = wpa_ref.shape[0]
    c = pl.program_id(1)

    @pl.when(c == 0)
    def _():
        acc_ref[...] = jnp.zeros_like(acc_ref)

    # scores[i, j] = leaky_relu(a_d[i] + a_s[j], 0.2); m is the exact unmasked row max
    # (precomputed O(N) in the wrapper) -- exp args are always <= 0.
    t = ad_ref[...] + as_ref[...]                                   # [TR, TC]
    s = jnp.maximum(t, 0.2 * t)
    p = jnp.exp(s - m_ref[...]).astype(BF16) * adj_ref[...]         # off-edge zeroed, dups counted
    # Aggregate (and the softmax denominator, via the ones lane of xs1) on the MXU.
    acc_ref[...] += jnp.dot(p, xs1_ref[...], preferred_element_type=F32)   # [TR, H+1]

    @pl.when(c == pl.num_programs(1) - 1)
    def _():
        agg = acc_ref[:, :hidden]                                   # sum_j e_ij * x_src_j
        denom = jnp.maximum(acc_ref[:, hidden:], 1e-30)             # sum_j e_ij  (>0 via self-loops)
        scale = invdeg_ref[...] * pl.reciprocal(denom, approx=True) # softmax norm * mean aggr
        g = agg * scale + bg_ref[...]
        # post_lin MLP (Linear -> ReLU -> Linear) + block ReLU (BN / dropout identity in eval)
        t1 = jnp.dot(g.astype(BF16), wpa_ref[...], preferred_element_type=F32) + bpa_ref[...]
        t1 = jnp.maximum(t1, 0.0)
        t2 = jnp.dot(t1.astype(BF16), wpb_ref[...], preferred_element_type=F32) + bpb_ref[...]
        o_ref[...] = jnp.maximum(t2, 0.0).astype(BF16)


# ---------------------------------------------------------------------------
# Kernel 4: global_mean_pool + classifier (grid-less; pooled sizes are tiny)
# ---------------------------------------------------------------------------
def _pool_classifier_kernel(pool_ref, invcnt_ref, h_ref, wc_ref, bc_ref, o_ref):
    pooled = jnp.dot(pool_ref[...], h_ref[...], preferred_element_type=F32) * invcnt_ref[...]
    o_ref[...] = jnp.dot(pooled.astype(BF16), wc_ref[...],
                         preferred_element_type=F32) + bc_ref[...]


# ---------------------------------------------------------------------------
# Full forward
# ---------------------------------------------------------------------------
def homo_gnn_gat_forward(x, edge_index, batch, params, num_graphs,
                         *, row_block=256, col_block=512):
    assert row_block % 128 == 0 and col_block % 128 == 0, "blocks must be multiples of 128"

    n, f_in = x.shape
    we1, be1, we2, be2 = params["node_emb"]
    wc, bc = params["classifier"]
    hidden = we2.shape[1]
    num_classes = wc.shape[1]

    # --- pad node count so both tile sizes divide it ------------------------------------
    lcm = (row_block * col_block) // math.gcd(row_block, col_block)
    n_pad = _round_up(n, lcm)
    tr, tc = row_block, col_block
    nr, nc = n_pad // tr, n_pad // tc

    x_p = jnp.zeros((n_pad, f_in), BF16).at[:n].set(x.astype(BF16))

    # --- dense adjacency with edge multiplicity; GATConv removes then re-adds self-loops --
    src, dst = edge_index[0], edge_index[1]
    adj = jnp.zeros((n_pad, n_pad), F32).at[dst, src].add(1.0)
    eye = jnp.eye(n_pad, dtype=F32)
    adj = adj * (1.0 - eye) + eye                 # padded nodes also get a self-loop (deg >= 1)
    deg = jnp.sum(adj, axis=-1, keepdims=True)    # [N, 1] in-degree
    inv_deg = 1.0 / deg                           # exact divide, once, in the wrapper
    adj = adj.astype(BF16)                        # small integer counts -> exact in bf16

    # --- mean-pool matrix (padded nodes map out of range -> all-zero one-hot rows) -------
    batch_p = jnp.concatenate([batch.astype(jnp.int32),
                               jnp.full((n_pad - n,), num_graphs, jnp.int32)])
    pool = jnp.transpose(jax.nn.one_hot(batch_p, num_graphs, dtype=F32))     # [B, N]
    inv_cnt = 1.0 / jnp.maximum(jnp.sum(pool, axis=1, keepdims=True), 1.0)   # [B, 1]
    pool = pool.astype(BF16)

    row_par = pltpu.CompilerParams(dimension_semantics=("parallel",))

    # ---------------- node embedding MLP ----------------
    h = pl.pallas_call(
        _node_emb_kernel,
        out_shape=jax.ShapeDtypeStruct((n_pad, hidden), BF16),
        grid=(nr,),
        in_specs=[
            pl.BlockSpec((tr, f_in), lambda r: (r, 0)),
            pl.BlockSpec((f_in, hidden), lambda r: (0, 0)),
            pl.BlockSpec((1, hidden), lambda r: (0, 0)),
            pl.BlockSpec((hidden, hidden), lambda r: (0, 0)),
            pl.BlockSpec((1, hidden), lambda r: (0, 0)),
        ],
        out_specs=pl.BlockSpec((tr, hidden), lambda r: (r, 0)),
        compiler_params=row_par,
    )(x_p, we1.astype(BF16), be1, we2.astype(BF16), be2)

    # ---------------- conv blocks: GATConv + post-MLP + ReLU ----------------
    for blk in params["conv_blocks"]:
        wsrc, wdst, asrc, adst, bg = blk["gat"]
        wpa, bpa, wpb, bpb = blk["post"]
        wg = jnp.concatenate([wsrc, wdst], axis=1).astype(BF16)              # [H, 2H]

        xs1, a_s, a_d = pl.pallas_call(
            _project_kernel,
            out_shape=(
                jax.ShapeDtypeStruct((n_pad, hidden + 1), BF16),             # [x_src | 1]
                jax.ShapeDtypeStruct((1, n_pad), F32),                       # a_s (lane-major)
                jax.ShapeDtypeStruct((n_pad, 1), F32),                       # a_d
            ),
            grid=(nr,),
            in_specs=[
                pl.BlockSpec((tr, hidden), lambda r: (r, 0)),
                pl.BlockSpec((hidden, 2 * hidden), lambda r: (0, 0)),
                pl.BlockSpec((1, hidden), lambda r: (0, 0)),
                pl.BlockSpec((1, hidden), lambda r: (0, 0)),
            ],
            out_specs=(
                pl.BlockSpec((tr, hidden + 1), lambda r: (r, 0)),
                pl.BlockSpec((1, tr), lambda r: (0, r)),
                pl.BlockSpec((tr, 1), lambda r: (r, 0)),
            ),
            compiler_params=row_par,
        )(h, wg, asrc.astype(BF16), adst.astype(BF16))

        # Exact unmasked per-row max in O(N): leaky_relu is monotone, and the per-row shift
        # cancels in the softmax ratio, so stability only needs m >= every score in the row.
        t = a_d + jnp.max(a_s)
        m_row = jnp.maximum(t, 0.2 * t)                                      # [N, 1]

        h = pl.pallas_call(
            _attn_kernel,
            out_shape=jax.ShapeDtypeStruct((n_pad, hidden), BF16),
            grid=(nr, nc),
            in_specs=[
                pl.BlockSpec((tr, 1), lambda r, c: (r, 0)),            # a_d
                pl.BlockSpec((tr, 1), lambda r, c: (r, 0)),            # row max
                pl.BlockSpec((1, tc), lambda r, c: (0, c)),            # a_s (streamed cols)
                pl.BlockSpec((tr, tc), lambda r, c: (r, c)),           # adj (streamed, bf16)
                pl.BlockSpec((tc, hidden + 1), lambda r, c: (c, 0)),   # [x_src | 1] (streamed)
                pl.BlockSpec((tr, 1), lambda r, c: (r, 0)),            # 1 / deg
                pl.BlockSpec((1, hidden), lambda r, c: (0, 0)),        # GAT bias
                pl.BlockSpec((hidden, hidden), lambda r, c: (0, 0)),   # post-MLP W1
                pl.BlockSpec((1, hidden), lambda r, c: (0, 0)),        # post-MLP b1
                pl.BlockSpec((hidden, hidden), lambda r, c: (0, 0)),   # post-MLP W2
                pl.BlockSpec((1, hidden), lambda r, c: (0, 0)),        # post-MLP b2
            ],
            out_specs=pl.BlockSpec((tr, hidden), lambda r, c: (r, 0)),
            scratch_shapes=[pltpu.VMEM((tr, hidden + 1), F32)],
            compiler_params=pltpu.CompilerParams(
                dimension_semantics=("parallel", "arbitrary"),
                # Safe on v5e/v6e (128 MiB) and v7x (64 MiB physical); raise on v5e/v6e if
                # larger row/col blocks are desired.
                vmem_limit_bytes=48 * 1024 * 1024,
            ),
        )(a_d, m_row, a_s, adj, xs1, inv_deg, bg,
          wpa.astype(BF16), bpa, wpb.astype(BF16), bpb)

    # ---------------- global_mean_pool + classifier ----------------
    vmem = pl.BlockSpec(memory_space=pltpu.MemorySpace.VMEM)
    return pl.pallas_call(
        _pool_classifier_kernel,
        out_shape=jax.ShapeDtypeStruct((num_graphs, num_classes), F32),
        in_specs=[vmem] * 5,
        out_specs=vmem,
    )(pool, inv_cnt, h, wc.astype(BF16), bc)


# ---------------------------------------------------------------------------
# Deterministic parameter construction + demo
# ---------------------------------------------------------------------------
def _lin(key, fan_in, fan_out):
    return jax.random.normal(key, (fan_in, fan_out), jnp.float32) * (1.0 / jnp.sqrt(fan_in))


def make_params(key, in_feat, hidden, num_classes, conv_layers=2):
    keys = iter(jax.random.split(key, 64))
    params = {
        "node_emb": (
            _lin(next(keys), in_feat, hidden), jnp.zeros((1, hidden), jnp.float32),
            _lin(next(keys), hidden, hidden), jnp.zeros((1, hidden), jnp.float32),
        ),
        "conv_blocks": [],
        "classifier": (
            _lin(next(keys), hidden, num_classes), jnp.zeros((1, num_classes), jnp.float32),
        ),
    }
    for _ in range(conv_layers):
        blk = {
            "gat": (
                _lin(next(keys), hidden, hidden),                               # W_src (lin_src)
                _lin(next(keys), hidden, hidden),                               # W_dst (lin_dst)
                jax.random.normal(next(keys), (1, hidden), jnp.float32) * 0.1,  # att_src
                jax.random.normal(next(keys), (1, hidden), jnp.float32) * 0.1,  # att_dst
                jnp.zeros((1, hidden), jnp.float32),                            # bias
            ),
            "post": (
                _lin(next(keys), hidden, hidden), jnp.zeros((1, hidden), jnp.float32),
                _lin(next(keys), hidden, hidden), jnp.zeros((1, hidden), jnp.float32),
            ),
        }
        params["conv_blocks"].append(blk)
    return params


if __name__ == "__main__":
    N, F_IN, HIDDEN, NUM_CLASSES, NUM_GRAPHS, E = 256, 16, 32, 4, 2, 800

    key = jax.random.PRNGKey(0)
    k_x, k_src, k_dst, k_param = jax.random.split(key, 4)

    x = jax.random.normal(k_x, (N, F_IN), jnp.float32)
    src = jax.random.randint(k_src, (E,), 0, N)
    dst = jax.random.randint(k_dst, (E,), 0, N)
    edge_index = jnp.stack([src, dst]).astype(jnp.int32)          # [2, E]
    batch = (jnp.arange(N) >= N // 2).astype(jnp.int32)           # [N], 2 graphs

    params = make_params(k_param, F_IN, HIDDEN, NUM_CLASSES)

    # Small tiles so the demo exercises a real (rows x cols) attention grid: (2, 2).
    out = homo_gnn_gat_forward(x, edge_index, batch, params, NUM_GRAPHS,
                               row_block=128, col_block=128)
    out = jax.block_until_ready(out)
    assert out.shape == (NUM_GRAPHS, NUM_CLASSES)
    assert bool(jnp.all(jnp.isfinite(out)))
    print("KERNEL_OK")
</pallas_src>

<mosaic_0001>
module attributes {stable_mosaic.version = 11 : i64} {
  func.func @_node_emb_kernel(%arg0: i32, %arg1: memref<128x16xbf16, #tpu.memory_space<vmem>>, %arg2: memref<16x32xbf16, #tpu.memory_space<vmem>>, %arg3: memref<1x32xf32, #tpu.memory_space<vmem>>, %arg4: memref<32x32xbf16, #tpu.memory_space<vmem>>, %arg5: memref<1x32xf32, #tpu.memory_space<vmem>>, %arg6: memref<128x32xbf16, #tpu.memory_space<vmem>>) attributes {dimension_semantics = [#tpu.dimension_semantics<parallel>], iteration_bounds = array<i64: 2>, scalar_prefetch = 0 : i64, scratch_operands = 0 : i64, tpu.core_type = #tpu.core_type<tc>, window_params = [{transform_indices = @transform_0, window_bounds = array<i64: 128, 16>}, {pipeline_mode = #tpu.pipeline_mode<synchronous>, transform_indices = @transform_1, window_bounds = array<i64: 16, 32>}, {pipeline_mode = #tpu.pipeline_mode<synchronous>, transform_indices = @transform_2, window_bounds = array<i64: 1, 32>}, {pipeline_mode = #tpu.pipeline_mode<synchronous>, transform_indices = @transform_3, window_bounds = array<i64: 32, 32>}, {pipeline_mode = #tpu.pipeline_mode<synchronous>, transform_indices = @transform_4, window_bounds = array<i64: 1, 32>}, {transform_indices = @transform_5, window_bounds = array<i64: 128, 32>}]} {
    %c0 = arith.constant 0 : index
    %c0_0 = arith.constant 0 : index
    %0 = vector.load %arg1[%c0, %c0_0] : memref<128x16xbf16, #tpu.memory_space<vmem>>, vector<128x16xbf16>
    %c0_1 = arith.constant 0 : index
    %c0_2 = arith.constant 0 : index
    %1 = vector.load %arg2[%c0_1, %c0_2] : memref<16x32xbf16, #tpu.memory_space<vmem>>, vector<16x32xbf16>
    %cst = arith.constant dense<0.000000e+00> : vector<128x32xf32>
    %2 = tpu.matmul %0, %1, %cst {dimension_numbers = #tpu.dot_dimension_numbers<[1], [0], [0], [1], [0, 0, 1, 1], [], []>} : vector<128x16xbf16>, vector<16x32xbf16>, vector<128x32xf32> -> vector<128x32xf32>
    %c0_3 = arith.constant 0 : index
    %c0_4 = arith.constant 0 : index
    %3 = vector.load %arg3[%c0_3, %c0_4] : memref<1x32xf32, #tpu.memory_space<vmem>>, vector<1x32xf32>
    %4 = vector.broadcast %3 : vector<1x32xf32> to vector<128x32xf32>
    %5 = arith.addf %2, %4 : vector<128x32xf32>
    %cst_5 = arith.constant 0.000000e+00 : f32
    %6 = vector.broadcast %cst_5 : f32 to vector<128x32xf32>
    %7 = arith.maximumf %5, %6 : vector<128x32xf32>
    %8 = arith.truncf %7 : vector<128x32xf32> to vector<128x32xbf16>
    %c0_6 = arith.constant 0 : index
    %c0_7 = arith.constant 0 : index
    %9 = vector.load %arg4[%c0_6, %c0_7] : memref<32x32xbf16, #tpu.memory_space<vmem>>, vector<32x32xbf16>
    %cst_8 = arith.constant dense<0.000000e+00> : vector<128x32xf32>
    %10 = tpu.matmul %8, %9, %cst_8 {dimension_numbers = #tpu.dot_dimension_numbers<[1], [0], [0], [1], [0, 0, 1, 1], [], []>} : vector<128x32xbf16>, vector<32x32xbf16>, vector<128x32xf32> -> vector<128x32xf32>
    %c0_9 = arith.constant 0 : index
    %c0_10 = arith.constant 0 : index
    %11 = vector.load %arg5[%c0_9, %c0_10] : memref<1x32xf32, #tpu.memory_space<vmem>>, vector<1x32xf32>
    %12 = vector.broadcast %11 : vector<1x32xf32> to vector<128x32xf32>
    %13 = arith.addf %10, %12 : vector<128x32xf32>
    %14 = arith.truncf %13 : vector<128x32xf32> to vector<128x32xbf16>
    %c0_11 = arith.constant 0 : index
    %c0_12 = arith.constant 0 : index
    %15 = vector.load %arg6[%c0_11, %c0_12] : memref<128x32xbf16, #tpu.memory_space<vmem>>, vector<128x32xbf16>
    tpu.vector_store %arg6[%c0_11, %c0_12], %14 {strides = array<i32>} : memref<128x32xbf16, #tpu.memory_space<vmem>>, vector<128x32xbf16>,
    return
  }
  func.func @transform_0(%arg0: i32) -> (i32, i32) {
    %c0_i32 = arith.constant 0 : i32
    %c0_i32_0 = arith.constant 0 : i32
    return %arg0, %c0_i32 : i32, i32
  }
  func.func @transform_1(%arg0: i32) -> (i32, i32) {
    %c0_i32 = arith.constant 0 : i32
    %c0_i32_0 = arith.constant 0 : i32
    %c0_i32_1 = arith.constant 0 : i32
    return %c0_i32, %c0_i32_0 : i32, i32
  }
  func.func @transform_2(%arg0: i32) -> (i32, i32) {
    %c0_i32 = arith.constant 0 : i32
    %c0_i32_0 = arith.constant 0 : i32
    %c0_i32_1 = arith.constant 0 : i32
    return %c0_i32, %c0_i32_0 : i32, i32
  }
  func.func @transform_3(%arg0: i32) -> (i32, i32) {
    %c0_i32 = arith.constant 0 : i32
    %c0_i32_0 = arith.constant 0 : i32
    %c0_i32_1 = arith.constant 0 : i32
    return %c0_i32, %c0_i32_0 : i32, i32
  }
  func.func @transform_4(%arg0: i32) -> (i32, i32) {
    %c0_i32 = arith.constant 0 : i32
    %c0_i32_0 = arith.constant 0 : i32
    %c0_i32_1 = arith.constant 0 : i32
    return %c0_i32, %c0_i32_0 : i32, i32
  }
  func.func @transform_5(%arg0: i32) -> (i32, i32) {
    %c0_i32 = arith.constant 0 : i32
    %c0_i32_0 = arith.constant 0 : i32
    return %arg0, %c0_i32 : i32, i32
  }
}

</mosaic_0001>

<bundles_post_ra>
// kernel: tpu_custom_call.1
= control target key start
LH: loop header
LB: loop body
LE: loop exit
PB: predicated region body
PF: predicated region fallthrough
CT: control target
= control target key end

     0   :  { %s914_s18 = smov 0   ;;  %s1021_s0 = inlined_call_operand.vmem [shape: bf16[256,16], index: 0, kind: input, shape index: {}]   ;;  %s1022_s1 = inlined_call_operand.vmem [shape: bf16[16,32], index: 1, kind: input, shape index: {}]   ;;  %s1023_s2 = inlined_call_operand.vmem [shape: f32[1,32], index: 2, kind: input, shape index: {}]   ;;  %s1024_s3 = inlined_call_operand.vmem [shape: bf16[32,32], index: 3, kind: input, shape index: {}]   ;;  %s1025_s4 = inlined_call_operand.vmem [shape: f32[1,32], index: 4, kind: input, shape index: {}]   ;;  %s1026_s5 = inlined_call_operand.vmem [shape: bf16[256,32], index: 5, kind: output, shape index: {}]  }
   0x1 LB: > { %s728_s19 = sadd.s32 4294967295, %s882_s18   ;;  %p732_p0 = scmp.ge.s32.totalorder %s882_s18, 1  ;;  %s882_s18 = sphi %s914_s18, %s15_s18  }
   0x2   : > { %p188_p1 = scmp.lt.s32.totalorder %s882_s18, 3 }
   0x4   : > { %p189_p2 = pnand %p732_p0, %p188_p1 }
   0x5   : > { %s733_s22 = sshll.u32 (!%p189_p2), %s728_s19, 4 }
   0x6   : > { %192 = sbr.rel (%p189_p2) target bundleno = 450 (0x1c2), region = 40  ;;  %p217_p3 = scmp.lt.s32.totalorder (!%p189_p2), %s733_s22, 31 }
   0xb   : > { %v865_v0 = vld [vmem:[%s1022_s1] sm:$0xff]   ;;  %s1028_s22 = smov (!%p217_p3, %s733_s22), 31  ;;  %vm300_vm0 = vcmask 130048   ;;  %v874_v9 = vld [vmem:[%s1024_s3 + $0x8] sm:$0xff]   ;;  %vm469_vm1 = vcmask 261120   ;;  %vm655_vm2 = vcmask 257024  }
   0xc   : > { %819 = vmatprep.subr.bf16.mxu0 %v865_v0  ;;  %s734_s23 = sshll.u32 %s1028_s22, 2  ;;  %837 = vmatprep.subr.bf16.mxu1 %v874_v9  ;;  %v875_v10 = vld [vmem:[%s1024_s3] sm:$0xff]  }
   0xd   : > { %820 = vmatpush3.bf16.msra.mxu0 %v865_v0  ;;  %s220_s26 = scalar_lea.vmem %s1021_s0, %s734_s23  ;;  %838 = vmatpush3.bf16.msra.mxu1 %v874_v9  ;;  %v737_v13 = vld [vmem:[%s1023_s2] ss:$0 sm:$0xff]  ;;  %s969_s12 = scalar_lea.vmem %s1026_s5, %s734_s23 }
   0xe   : > { %v866_v1 = vld [vmem:[%s220_s26] sm:$0xff]   ;;  %v867_v2 = vld [vmem:[%s220_s26 + $0x8] sm:$0xff]   ;;  %v868_v3 = vld [vmem:[%s220_s26 + $0x10] sm:$0xff]   ;;  %839 = vmatprep.subr.bf16.mxu1 %v875_v10 }
   0xf   : > { %821 = vmatprep.mubr.msk.bf16.mxu0 %vm300_vm0, %v866_v1  ;;  %v869_v4 = vld [vmem:[%s220_s26 + $0x18] sm:$0xff]   ;;  %v870_v5 = vld [vmem:[%s220_s26 + $0x20] sm:$0xff]   ;;  %v871_v6 = vld [vmem:[%s220_s26 + $0x28] sm:$0xff]  }
  0x10   : > { %822 = vmatmul.mubr.msk.bf16.vlgmr.msra.gmra.mxu0 %vm300_vm0, %v867_v2  ;;  %v872_v7 = vld [vmem:[%s220_s26 + $0x30] sm:$0xff]   ;;  %v873_v8 = vld [vmem:[%s220_s26 + $0x38] sm:$0xff]  }
  0x11   : > { %825 = vmatprep.mubr.msk.bf16.mxu0 %vm300_vm0, %v868_v3  ;;  %840 = vmatpush3.bf16.msra.mxu1 %v875_v10 }
  0x18   : > { %826 = vmatmul.mubr.msk.bf16.gmra.mxu0 %vm300_vm0, %v869_v4  ;;  %v961_v4 = vld [vmem:[%s1025_s4] ss:$0 sm:$0xff] }
  0x19   : > { %829 = vmatprep.mubr.msk.bf16.mxu0 %vm300_vm0, %v870_v5 }
  0x20   : > { %830 = vmatmul.mubr.msk.bf16.gmra.mxu0 %vm300_vm0, %v871_v6 }
  0x21   : > { %833 = vmatprep.mubr.msk.bf16.mxu0 %vm300_vm0, %v872_v7 }
  0x28   : > { %834 = vmatmul.mubr.msk.bf16.gmra.mxu0 %vm300_vm0, %v873_v8 }
  0xd0   : > { %v823_v11 = vpop.f32.mrf.mxu0 }
  0xd1   : > { %v368_v17 = vadd.f32 %v823_v11, %v737_v13 }
  0xd2   : > { %v359_v12 = vpop.f32.mrf.mxu0 }
  0xd3   : > { %v360_v15 = vadd.f32 %v737_v13, %v359_v12  ;;  %v424_v24 = vmax.f32 %v368_v17, 0.0 }
  0xd4   : > { %v824_v14 = vpop.f32.mrf.mxu0 }
  0xd5   : > { %v371_v16 = vadd.f32 %v824_v14, %v737_v13  ;;  %v422_v22 = vmax.f32 %v360_v15, 0.0 }
  0xd6   : > { %v362_v18 = vpop.f32.mrf.mxu0 }
  0xd7   : > { %v363_v19 = vadd.f32 %v737_v13, %v362_v18  ;;  %v425_v20 = vmax.f32 %v371_v16, 0.0 }
  0xd8   : > { %v827_v21 = vpop.f32.mrf.mxu0 }
  0xd9   : > { %v423_v23 = vmax.f32 %v363_v19, 0.0  ;;  %v439_v27 = vpack.c.bf16 %v425_v20, %v424_v24  ;;  %v384_v31 = vadd.f32 %v827_v21, %v737_v13 }
  0xda   : > { %v375_v25 = vpop.f32.mrf.mxu0 }
  0xdb   : > { %v438_v26 = vpack.c.bf16 %v423_v23, %v422_v22  ;;  %v376_v29 = vadd.f32 %v737_v13, %v375_v25  ;;  %v428_v38 = vmax.f32 %v384_v31, 0.0 }
  0xdc   : > { %v828_v28 = vpop.f32.mrf.mxu0 }
  0xdd   : > { %v387_v30 = vadd.f32 %v828_v28, %v737_v13  ;;  %841 = vmatprep.mubr.msk.bf16.mxu1 %vm469_vm1, %v438_v26  ;;  %v426_v36 = vmax.f32 %v376_v29, 0.0 }
  0xde   : > { %v378_v32 = vpop.f32.mrf.mxu0  ;;  %842 = vmatmul.mubr.msk.bf16.vlgmr.msra.gmra.mxu1 %vm469_vm1, %v439_v27 }
  0xdf   : > { %v379_v33 = vadd.f32 %v737_v13, %v378_v32  ;;  %v429_v34 = vmax.f32 %v387_v30, 0.0 }
  0xe0   : > { %v831_v35 = vpop.f32.mrf.mxu0 }
  0xe1   : > { %v427_v37 = vmax.f32 %v379_v33, 0.0  ;;  %v441_v41 = vpack.c.bf16 %v429_v34, %v428_v38  ;;  %v400_v45 = vadd.f32 %v831_v35, %v737_v13 }
  0xe2   : > { %v391_v39 = vpop.f32.mrf.mxu0 }
  0xe3   : > { %v440_v40 = vpack.c.bf16 %v427_v37, %v426_v36  ;;  %v392_v43 = vadd.f32 %v737_v13, %v391_v39  ;;  %v432_v52 = vmax.f32 %v400_v45, 0.0 }
  0xe4   : > { %v832_v42 = vpop.f32.mrf.mxu0 }
  0xe5   : > { %v403_v44 = vadd.f32 %v832_v42, %v737_v13  ;;  %845 = vmatprep.mubr.msk.bf16.mxu1 %vm469_vm1, %v440_v40  ;;  %v430_v50 = vmax.f32 %v392_v43, 0.0 }
  0xe6   : > { %v394_v46 = vpop.f32.mrf.mxu0  ;;  %846 = vmatmul.mubr.msk.bf16.gmra.mxu1 %vm469_vm1, %v441_v41 }
  0xe7   : > { %v395_v47 = vadd.f32 %v737_v13, %v394_v46  ;;  %v433_v48 = vmax.f32 %v403_v44, 0.0 }
  0xe8   : > { %v835_v49 = vpop.f32.mrf.mxu0 }
  0xe9   : > { %v431_v51 = vmax.f32 %v395_v47, 0.0  ;;  %v443_v55 = vpack.c.bf16 %v433_v48, %v432_v52  ;;  %v416_v59 = vadd.f32 %v835_v49, %v737_v13 }
  0xea   : > { %v407_v53 = vpop.f32.mrf.mxu0 }
  0xeb   : > { %v442_v54 = vpack.c.bf16 %v431_v51, %v430_v50  ;;  %v408_v57 = vadd.f32 %v737_v13, %v407_v53  ;;  %v436_v1 = vmax.f32 %v416_v59, 0.0 }
  0xec   : > { %v836_v56 = vpop.f32.mrf.mxu0 }
  0xed   : > { %v419_v58 = vadd.f32 %v836_v56, %v737_v13  ;;  %849 = vmatprep.mubr.msk.bf16.mxu1 %vm469_vm1, %v442_v54  ;;  %v434_v63 = vmax.f32 %v408_v57, 0.0 }
  0xee   : > { %v410_v60 = vpop.f32.mrf.mxu0  ;;  %850 = vmatmul.mubr.msk.bf16.gmra.mxu1 %vm469_vm1, %v443_v55 }
  0xef   : > { %v411_v61 = vadd.f32 %v737_v13, %v410_v60  ;;  %v437_v62 = vmax.f32 %v419_v58, 0.0 }
  0xf1   : > { %v435_v0 = vmax.f32 %v411_v61, 0.0  ;;  %v445_v3 = vpack.c.bf16 %v437_v62, %v436_v1 }
  0xf3   : > { %v444_v2 = vpack.c.bf16 %v435_v0, %v434_v63 }
  0xf5   : > { %853 = vmatprep.mubr.msk.bf16.mxu1 %vm469_vm1, %v444_v2 }
  0xf6   : > { %854 = vmatmul.mubr.msk.bf16.gmra.mxu1 %vm469_vm1, %v445_v3 }
 0x19e   : > { %v843_v5 = vpop.f32.mrf.mxu1 }
 0x19f   : > { %v537_v6 = vadd.f32 %v843_v5, %v961_v4 }
 0x1a0   : > { %v528_v7 = vpop.f32.mrf.mxu1 }
 0x1a1   : > { %v786_v8 = vpack.c.bf16 %v537_v6, %v537_v6  ;;  %v529_v9 = vadd.f32 %v961_v4, %v528_v7 }
 0x1a2   : > { %v844_v10 = vpop.f32.mrf.mxu1 }
 0x1a3   : > { %658 = vst.msk [vmem:[%s969_s12 + $0x8] sm:$0xf] %vm655_vm2, %v786_v8  ;;  %v784_v11 = vpack.c.bf16 %v529_v9, %v529_v9  ;;  %v540_v12 = vadd.f32 %v844_v10, %v961_v4 }
 0x1a4   : > { %v531_v13 = vpop.f32.mrf.mxu1 }
 0x1a5   : > { %656 = vst.msk [vmem:[%s969_s12] sm:$0xf] %vm655_vm2, %v784_v11  ;;  %v787_v14 = vpack.c.bf16 %v540_v12, %v540_v12  ;;  %v532_v15 = vadd.f32 %v961_v4, %v531_v13 }
 0x1a6   : > { %v847_v16 = vpop.f32.mrf.mxu1 }
 0x1a7   : > { %659 = vst.msk [vmem:[%s969_s12 + $0xc] sm:$0xf] %vm655_vm2, %v787_v14  ;;  %v785_v17 = vpack.c.bf16 %v532_v15, %v532_v15  ;;  %v553_v18 = vadd.f32 %v847_v16, %v961_v4 }
 0x1a8   : > { %v544_v19 = vpop.f32.mrf.mxu1 }
 0x1a9   : > { %657 = vst.msk [vmem:[%s969_s12 + $0x4] sm:$0xf] %vm655_vm2, %v785_v17  ;;  %v790_v20 = vpack.c.bf16 %v553_v18, %v553_v18  ;;  %v545_v21 = vadd.f32 %v961_v4, %v544_v19 }
 0x1aa   : > { %v848_v22 = vpop.f32.mrf.mxu1 }
 0x1ab   : > { %662 = vst.msk [vmem:[%s969_s12 + $0x18] sm:$0xf] %vm655_vm2, %v790_v20  ;;  %v788_v23 = vpack.c.bf16 %v545_v21, %v545_v21  ;;  %v556_v24 = vadd.f32 %v848_v22, %v961_v4 }
 0x1ac   : > { %v547_v25 = vpop.f32.mrf.mxu1 }
 0x1ad   : > { %660 = vst.msk [vmem:[%s969_s12 + $0x10] sm:$0xf] %vm655_vm2, %v788_v23  ;;  %v791_v26 = vpack.c.bf16 %v556_v24, %v556_v24  ;;  %v548_v27 = vadd.f32 %v961_v4, %v547_v25 }
 0x1ae   : > { %v851_v28 = vpop.f32.mrf.mxu1 }
 0x1af   : > { %663 = vst.msk [vmem:[%s969_s12 + $0x1c] sm:$0xf] %vm655_vm2, %v791_v26  ;;  %v789_v29 = vpack.c.bf16 %v548_v27, %v548_v27  ;;  %v569_v30 = vadd.f32 %v851_v28, %v961_v4 }
 0x1b0   : > { %v560_v31 = vpop.f32.mrf.mxu1 }
 0x1b1   : > { %661 = vst.msk [vmem:[%s969_s12 + $0x14] sm:$0xf] %vm655_vm2, %v789_v29  ;;  %v794_v32 = vpack.c.bf16 %v569_v30, %v569_v30  ;;  %v561_v33 = vadd.f32 %v961_v4, %v560_v31 }
 0x1b2   : > { %v852_v34 = vpop.f32.mrf.mxu1 }
 0x1b3   : > { %666 = vst.msk [vmem:[%s969_s12 + $0x28] sm:$0xf] %vm655_vm2, %v794_v32  ;;  %v792_v35 = vpack.c.bf16 %v561_v33, %v561_v33  ;;  %v572_v36 = vadd.f32 %v852_v34, %v961_v4 }
 0x1b4   : > { %v563_v37 = vpop.f32.mrf.mxu1 }
 0x1b5   : > { %664 = vst.msk [vmem:[%s969_s12 + $0x20] sm:$0xf] %vm655_vm2, %v792_v35  ;;  %v795_v38 = vpack.c.bf16 %v572_v36, %v572_v36  ;;  %v564_v39 = vadd.f32 %v961_v4, %v563_v37 }
 0x1b6   : > { %v855_v40 = vpop.f32.mrf.mxu1 }
 0x1b7   : > { %667 = vst.msk [vmem:[%s969_s12 + $0x2c] sm:$0xf] %vm655_vm2, %v795_v38  ;;  %v793_v41 = vpack.c.bf16 %v564_v39, %v564_v39  ;;  %v585_v42 = vadd.f32 %v855_v40, %v961_v4 }
 0x1b8   : > { %v576_v43 = vpop.f32.mrf.mxu1 }
 0x1b9   : > { %665 = vst.msk [vmem:[%s969_s12 + $0x24] sm:$0xf] %vm655_vm2, %v793_v41  ;;  %v798_v44 = vpack.c.bf16 %v585_v42, %v585_v42  ;;  %v577_v45 = vadd.f32 %v961_v4, %v576_v43 }
 0x1ba   : > { %v856_v46 = vpop.f32.mrf.mxu1 }
 0x1bb   : > { %670 = vst.msk [vmem:[%s969_s12 + $0x38] sm:$0xf] %vm655_vm2, %v798_v44  ;;  %v796_v47 = vpack.c.bf16 %v577_v45, %v577_v45  ;;  %v588_v48 = vadd.f32 %v856_v46, %v961_v4 }
 0x1bc   : > { %v579_v49 = vpop.f32.mrf.mxu1 }
 0x1bd   : > { %668 = vst.msk [vmem:[%s969_s12 + $0x30] sm:$0xf] %vm655_vm2, %v796_v47  ;;  %v799_v50 = vpack.c.bf16 %v588_v48, %v588_v48  ;;  %v580_v51 = vadd.f32 %v961_v4, %v579_v49 }
 0x1bf   : > { %671 = vst.msk [vmem:[%s969_s12 + $0x3c] sm:$0xf] %vm655_vm2, %v799_v50  ;;  %v797_v52 = vpack.c.bf16 %v580_v51, %v580_v51 }
 0x1c1   : > { %669 = vst.msk [vmem:[%s969_s12 + $0x34] sm:$0xf] %vm655_vm2, %v797_v52 }
 0x1c2 PF: > { %s15_s18 = sadd.s32 1, %s882_s18  }
 0x1c3   : > { %p12_p4 = scmp.ge.s32.totalorder %s15_s18, 4  }
 0x1c5   :  { %14 = sbr.rel (!%p12_p4) target bundleno = 1 (0x1), region = 70 }

</bundles_post_ra>
